<compile_context>
chip_gen: v7x
topology: tpu7x:2x2x1
jax: 0.10.0
libtpu: 0.0.40
codegen_flags: <defaults>
</compile_context>

<pallas_src>
import functools

import jax
import jax.numpy as jnp
from jax.experimental import pallas as pl
from jax.experimental.pallas import tpu as pltpu


def softlayer_kernel(x_ref, o_ref):
    # x_ref / o_ref : (TB, C, W) — softmax over the channel axis (axis=1),
    # then multiply elementwise by the input (SoftLayer.forward).
    x = x_ref[...]
    xf = x.astype(jnp.float32)                        # explicit f32 math
    m = jnp.max(xf, axis=1, keepdims=True)            # (TB, 1, W) sublane reduce
    e = jnp.exp(xf - m)                               # EUP
    s = jnp.sum(e, axis=1, keepdims=True)             # (TB, 1, W) sublane reduce
    inv = 1.0 / s                                     # one small divide, not C full-block divides
    o_ref[...] = (xf * e * inv).astype(o_ref.dtype)


@functools.partial(jax.jit, static_argnames=("target_block_bytes",))
def softlayer(x, *, target_block_bytes=2 << 20):
    """x: (B, C, W) float array. Returns x * softmax(x, axis=1)."""
    B, C, W = x.shape
    itemsize = jnp.dtype(x.dtype).itemsize
    row_bytes = C * W * itemsize

    # Batch tile sized for ~target_block_bytes per block (memory-bound op:
    # big blocks amortize the per-grid-step pipeline overhead).
    tb = int(max(1, min(B, target_block_bytes // max(1, row_bytes))))
    # Keep at least 2 grid steps when possible so v7x's two TensorCores both
    # get tiles under dimension_semantics=("parallel",).
    if tb >= B and B > 1:
        tb = (B + 1) // 2
    n_tiles = pl.cdiv(B, tb)

    # NOTE: no padding of B — the final partial block (if B % tb != 0) reads
    # out-of-bounds batch rows whose contents are unspecified, but the
    # per-(b, w) softmax means those rows only produce output rows that are
    # masked on write.  This avoids the pad + slice HBM round trips.
    return pl.pallas_call(
        softlayer_kernel,
        out_shape=jax.ShapeDtypeStruct((B, C, W), x.dtype),
        grid=(n_tiles,),
        in_specs=[pl.BlockSpec((tb, C, W), lambda i: (i, 0, 0))],
        out_specs=pl.BlockSpec((tb, C, W), lambda i: (i, 0, 0)),
        compiler_params=pltpu.CompilerParams(
            dimension_semantics=("parallel",),
            # ~10x the block (2x-buffered in+out + f32 temporaries) with
            # headroom; > v5e's 16 MiB scoped default, < v7x's 64 MiB VMEM.
            vmem_limit_bytes=48 << 20,
        ),
    )(x)


# ---------------- pure-JAX reference (mirrors the PyTorch forward) ----------------
def reference_forward(x):
    return x * jax.nn.softmax(x, axis=1)


if __name__ == "__main__":
    key = jax.random.PRNGKey(0)
    B, C, W = 4, 8, 128                 # (batch, channels, width) — small demo shapes
    x = jax.random.normal(key, (B, C, W), dtype=jnp.float32)

    out = jax.block_until_ready(softlayer(x))
    assert out.shape == (B, C, W), out.shape

    ref = jax.block_until_ready(reference_forward(x))
    err = float(jnp.max(jnp.abs(out - ref)))
    assert jnp.allclose(out, ref, atol=1e-5, rtol=1e-5), err

    # Also exercise a non-divisible batch (partial final block, no padding).
    x2 = jax.random.normal(jax.random.PRNGKey(1), (5, C, W), dtype=jnp.float32)
    out2 = jax.block_until_ready(softlayer(x2))
    ref2 = reference_forward(x2)
    assert jnp.allclose(out2, ref2, atol=1e-5, rtol=1e-5)

    print("KERNEL_OK")
</pallas_src>

<mosaic_0001>
module attributes {stable_mosaic.version = 11 : i64} {
  func.func @softlayer_kernel(%arg0: i32, %arg1: memref<2x8x128xf32, #tpu.memory_space<vmem>>, %arg2: memref<2x8x128xf32, #tpu.memory_space<vmem>>) attributes {dimension_semantics = [#tpu.dimension_semantics<parallel>], iteration_bounds = array<i64: 2>, scalar_prefetch = 0 : i64, scratch_operands = 0 : i64, tpu.core_type = #tpu.core_type<tc>, window_params = [{transform_indices = @transform_0, window_bounds = array<i64: 2, 8, 128>}, {transform_indices = @transform_1, window_bounds = array<i64: 2, 8, 128>}]} {
    %c0 = arith.constant 0 : index
    %c0_0 = arith.constant 0 : index
    %c0_1 = arith.constant 0 : index
    %0 = vector.load %arg1[%c0, %c0_0, %c0_1] : memref<2x8x128xf32, #tpu.memory_space<vmem>>, vector<2x8x128xf32>
    %cst = arith.constant dense<0xFF800000> : vector<2x128xf32>
    %1 = vector.multi_reduction <maximumf>, %0, %cst [1] : vector<2x8x128xf32> to vector<2x128xf32>
    %2 = vector.shape_cast %1 : vector<2x128xf32> to vector<2x1x128xf32>
    %3 = vector.broadcast %2 : vector<2x1x128xf32> to vector<2x8x128xf32>
    %4 = arith.subf %0, %3 : vector<2x8x128xf32>
    %5 = math.exp %4 : vector<2x8x128xf32>
    %cst_2 = arith.constant dense<0.000000e+00> : vector<2x128xf32>
    %6 = vector.multi_reduction <add>, %5, %cst_2 [1] : vector<2x8x128xf32> to vector<2x128xf32>
    %7 = vector.shape_cast %6 : vector<2x128xf32> to vector<2x1x128xf32>
    %cst_3 = arith.constant 1.000000e+00 : f32
    %8 = vector.broadcast %cst_3 : f32 to vector<2x1x128xf32>
    %9 = arith.divf %8, %7 : vector<2x1x128xf32>
    %10 = arith.mulf %0, %5 : vector<2x8x128xf32>
    %11 = vector.broadcast %9 : vector<2x1x128xf32> to vector<2x8x128xf32>
    %12 = arith.mulf %10, %11 : vector<2x8x128xf32>
    %c0_4 = arith.constant 0 : index
    %c0_5 = arith.constant 0 : index
    %c0_6 = arith.constant 0 : index
    %13 = vector.load %arg2[%c0_4, %c0_5, %c0_6] : memref<2x8x128xf32, #tpu.memory_space<vmem>>, vector<2x8x128xf32>
    tpu.vector_store %arg2[%c0_4, %c0_5, %c0_6], %12 {strides = array<i32>} : memref<2x8x128xf32, #tpu.memory_space<vmem>>, vector<2x8x128xf32>,
    return
  }
  func.func @transform_0(%arg0: i32) -> (i32, i32, i32) {
    %c0_i32 = arith.constant 0 : i32
    %c0_i32_0 = arith.constant 0 : i32
    %c0_i32_1 = arith.constant 0 : i32
    return %arg0, %c0_i32, %c0_i32_0 : i32, i32, i32
  }
  func.func @transform_1(%arg0: i32) -> (i32, i32, i32) {
    %c0_i32 = arith.constant 0 : i32
    %c0_i32_0 = arith.constant 0 : i32
    %c0_i32_1 = arith.constant 0 : i32
    return %arg0, %c0_i32, %c0_i32_0 : i32, i32, i32
  }
}

</mosaic_0001>

<bundles_post_ra>
// kernel: softlayer.1
= control target key start
LH: loop header
LB: loop body
LE: loop exit
PB: predicated region body
PF: predicated region fallthrough
CT: control target
= control target key end

     0   :  { %6 = vsyncpa [#allocation3], 0  ;;  %s620_s0 = inlined_call_operand.hbm [shape: f32[4,8,128], index: 0, kind: input, shape index: {}]   ;;  %s621_s1 = inlined_call_operand.hbm [shape: f32[4,8,128], index: 1, kind: output, shape index: {}]  }
   0x1   :  { %8 = vsyncpa [#allocation3 + $0x1], 0 }
   0x2   :  { %9 = vsyncpa [#allocation4], 0 }
   0x3   :  { %11 = vsyncpa [#allocation4 + $0x1], 0  ;;  %s454_s6 = smov 0   ;;  %s456_s7 = smov 0  }
   0x4   :  { %s458_s8 = smov 0   ;;  %s460_s9 = smov 0  }
   0x5 LB: > { %s475_s10 = sadd.s32 4294967295, %s436_s9   ;;  %s266_s11 = sadd.s32 4294967294, %s436_s9   ;;  %s436_s9 = sphi %s460_s9, %s634_s9   ;;  %s432_s8 = sphi %s458_s8, %s633_s8   ;;  %s428_s7 = sphi %s456_s7, %s632_s7   ;;  %s424_s6 = sphi %s454_s6, %s631_s6  }
   0x6   : > { %s479_s12 = sadd.s32 1, %s436_s9   ;;  %s24_s13 = sadd.s32 1, %s432_s8 }
   0x7   : > { %s21_s14 = ssub.s32 %s436_s9, %s479_s12  ;;  %p31_p0 = scmp.ne.s32.totalorder %s432_s8, %s428_s7 }
   0x8   : > { %p22_p1 = scmp.eq.s32.totalorder %s21_s14, 0  ;;  %p32_p2 = scmp.eq.s32.totalorder %s436_s9, 0 }
   0x9   : > { %p37_p3 = scmp.ne.s32.totalorder %s428_s7, %s424_s6  ;;  %p38_p4 = scmp.eq.s32.totalorder %s475_s10, 0 }
   0xa   : > { %s491_s15 = scalar_select %p22_p1, %s432_s8, %s24_s13  }
   0xb   : > { %p493_p5 = por %p32_p2, %p31_p0  ;;  %p497_p6 = por %p38_p4, %p37_p3 }
   0xc   : > { %p61_p7 = scmp.eq.s32.totalorder %s475_s10, 1  ;;  %p67_p8 = scmp.eq.s32.totalorder %s266_s11, 1 }
   0xd   : > { %p294_p10 = scmp.lt.s32.totalorder %s436_s9, 2  ;;  %s87_s20 = sand.u32 1, %s432_s8  }
   0xe   : > { %p504_p11 = por %p61_p7, %p31_p0  ;;  %p508_p12 = por %p67_p8, %p37_p3 }
   0xf   : > { %s280_s21 = sshll.u32 %s436_s9, 8  ;;  %s269_s22 = sshll.u32 %s87_s20, 4 }
  0x10   : > { %s625_s18 = scalar_select %p504_p11, 1, 0 }
  0x11   : > { %s626_s19 = scalar_select %p508_p12, 1, 0 }
  0x12   : > { %s517_s25 = scalar_lea.hbm %s620_s0, %s280_s21  ;;  %s91_s26 = scalar_lea.vmem [#allocation2], %s269_s22 }
  0x13   : > { %s98_s27 = sshll.u32 %s91_s26, 4  ;;  %p521_p13 = pnand %p294_p10, %p493_p5  ;;  %s525_s27 = int_to_ptr.vmem [resolvable:$true] %s98_s27 }
  0x14   : > { %s527_s29 = scalar_lea.sflag [#allocation3], %s87_s20  ;;  %s340_s30 = scalar_lea.hbm %s517_s25, 256 }
  0x15   : > { %p341_p0 = scmp.ne.s32.totalorder %s517_s25, %s340_s30  ;;  %p342_p1 = pneg %p521_p13 }
  0x16   : > { %s345_s4 = scalar_lea.hbm %s620_s0, 512  ;;  %p346_p4 = scmp.lt.u32.totalorder %s517_s25, %s620_s0 }
  0x17   : > { %p343_p2 = pnand %p342_p1, %p341_p0  ;;  %p347_p5 = scmp.lt.u32.totalorder %s345_s4, %s340_s30 }
  0x18   : > { %p349_p8 = scmp.lt.u32.totalorder %s340_s30, %s517_s25 }
  0x19   : > { %p344_p3 = pneg %p343_p2  ;;  %p348_p7 = por %p347_p5, %p346_p4 }
  0x1b   : > { %p350_p10 = por %p349_p8, %p348_p7 }
  0x1d   : > { %p351_p9 = pnand %p350_p10, %p344_p3 }
  0x1f   : > { %354 = shalt.err (!%p351_p9)
}
  0x20   : > { %s355_s13 = scalar_lea.vmem %s525_s27, 256  ;;  %s438_s14 = smov [#allocation2]  }
  0x21   : > { %p356_p0 = scmp.ne.s32.totalorder %s525_s27, %s355_s13  ;;  %s360_s16 = sshll.u32 %s438_s14, 4  ;;  %s361_s16 = int_to_ptr.vmem [resolvable:$false] %s360_s16 }
  0x22   : > { %s362_s20 = scalar_lea.vmem %s361_s16, 512  ;;  %p363_p11 = scmp.lt.s32.totalorder %s525_s27, %s361_s16 }
  0x23   : > { %p358_p2 = pnand %p356_p0, %p342_p1  ;;  %p364_p4 = scmp.lt.s32.totalorder %s362_s20, %s355_s13 }
  0x25   : > { %p359_p12 = pneg %p358_p2  ;;  %p365_p5 = por %p364_p4, %p363_p11 }
  0x27   : > { %p366_p7 = pnand %p365_p5, %p359_p12 }
  0x29   : > { %369 = shalt.err (!%p366_p7)
}
  0x2a   : > { %s439_s21 = smov 128   ;;  %s440_s22 = smov 8  }
  0x2b   : > { %289 = dma.hbm_to_vmem [thread:$0]  (!%p521_p13), %s517_s25, 256, %s525_s27, %s527_s29, %s439_s21, %s439_s21, %s440_s22  }
  0x2c   : > { %p272_p9 = scmp.ge.s32.totalorder %s436_s9, 1  ;;  %p106_p1 = scmp.lt.s32.totalorder %s436_s9, 3 }
  0x2e   : > { %p107_p3 = pnand %p272_p9, %p106_p1 }
  0x2f   : > { %s558_s23 = sand.u32 (!%p107_p3), 1, %s428_s7  }
  0x30   : > { %110 = sbr.rel (%p107_p3) target bundleno = 125 (0x7d), region = 24  ;;  %s273_s24 = sshll.u32 (!%p107_p3), %s558_s23, 4 }
  0x31   : > { %s113_s26 = scalar_lea.sflag (!%p107_p3), [#allocation3], %s558_s23  ;;  %s116_s30 = scalar_lea.vmem (!%p107_p3), [#allocation2], %s273_s24 }
  0x37   : > { %415 = dma.done.wait (%p497_p6), %s113_s26, 256  }
  0x38   : > { %417 = vsyncadd (%p497_p6), %s113_s26, 4294967040  ;;  %v137_v0 = vld [vmem:[%s116_s30] sm:$0xff]  ;;  %v138_v1 = vld [vmem:[%s116_s30 + $0x8] sm:$0xff]  ;;  %s134_s17 = scalar_lea.vmem [#allocation5], %s273_s24  ;;  %s281_s27 = sshll.u32 %s475_s10, 8 }
  0x39   : > { %v139_v2 = vrot.slane %v137_v0, 4  ;;  %v145_v3 = vrot.slane %v138_v1, 4  ;;  %s193_s25 = sshll.u32 %s134_s17, 4  ;;  %s576_s2 = scalar_lea.hbm %s621_s1, %s281_s27  ;;  %s571_s25 = int_to_ptr.vmem [resolvable:$true] %s193_s25 }
  0x3a   : > { %s180_s3 = scalar_lea.sflag [#allocation4], %s558_s23  ;;  %s370_s4 = scalar_lea.vmem %s571_s25, 256 }
  0x3b   : > { %v140_v4 = vmax.f32 %v137_v0, %v139_v2  ;;  %v146_v5 = vmax.f32 %v138_v1, %v145_v3  ;;  %p371_p6 = scmp.ne.s32.totalorder %s571_s25, %s370_s4  ;;  %p628_p11 = scmp.ne.s32.totalorder %s625_s18, 0 }
  0x3c   : > { %s441_s10 = smov [#allocation5]  }
  0x3d   : > { %v141_v6 = vrot.slane %v140_v4, 2  ;;  %v147_v7 = vrot.slane %v146_v5, 2  ;;  %p372_p12 = pnand %p371_p6, %p628_p11  ;;  %s374_s5 = sshll.u32 %s441_s10, 4  ;;  %s375_s5 = int_to_ptr.vmem [resolvable:$false] %s374_s5 }
  0x3e   : > { %s376_s11 = scalar_lea.vmem %s375_s5, 512  ;;  %p377_p8 = scmp.lt.s32.totalorder %s571_s25, %s375_s5 }
  0x3f   : > { %v142_v8 = vmax.f32 %v140_v4, %v141_v6  ;;  %v148_v9 = vmax.f32 %v146_v5, %v147_v7  ;;  %p373_p13 = pneg %p372_p12  ;;  %p378_p10 = scmp.lt.s32.totalorder %s376_s11, %s370_s4 }
  0x41   : > { %v143_v10 = vrot.slane %v142_v8, 1  ;;  %v149_v11 = vrot.slane %v148_v9, 1  ;;  %p379_p0 = por %p378_p10, %p377_p8 }
  0x43   : > { %v144_v12 = vmax.f32 %v142_v8, %v143_v10  ;;  %v150_v13 = vmax.f32 %v148_v9, %v149_v11  ;;  %p380_p2 = pnand %p379_p0, %p373_p13 }
  0x45   : > { %v151_v14 = vsub.f32 %v137_v0, %v144_v12  ;;  %v152_v15 = vsub.f32 %v138_v1, %v150_v13 }
  0x47   : > { %v153_v16 = vmul.f32 1.442695, %v151_v14  ;;  %v155_v17 = vmul.f32 1.442695, %v152_v15 }
  0x49   : > { %332 = vpow2.f32 %v153_v16 }
  0x4a   : > { %334 = vpow2.f32 %v155_v17 }
  0x53   : > { %v333_v18 = vpop.eup %332 }
  0x54   : > { %v335_v19 = vpop.eup %334  ;;  %v157_v20 = vrot.slane %v333_v18, 4  ;;  %v173_v32 = vmul.f32 %v333_v18, %v137_v0 }
  0x55   : > { %v163_v21 = vrot.slane %v335_v19, 4  ;;  %v174_v33 = vmul.f32 %v335_v19, %v138_v1 }
  0x56   : > { %v158_v22 = vadd.f32 %v333_v18, %v157_v20 }
  0x57   : > { %v164_v23 = vadd.f32 %v335_v19, %v163_v21 }
  0x58   : > { %v159_v24 = vrot.slane %v158_v22, 2 }
  0x59   : > { %v165_v25 = vrot.slane %v164_v23, 2 }
  0x5a   : > { %v160_v26 = vadd.f32 %v159_v24, %v158_v22 }
  0x5b   : > { %v166_v27 = vadd.f32 %v165_v25, %v164_v23 }
  0x5c   : > { %v161_v28 = vrot.slane %v160_v26, 1 }
  0x5d   : > { %v167_v29 = vrot.slane %v166_v27, 1 }
  0x5e   : > { %v162_v30 = vadd.f32 %v161_v28, %v160_v26 }
  0x5f   : > { %v168_v31 = vadd.f32 %v167_v29, %v166_v27 }
  0x60   : > { %336 = vrcp.f32 %v162_v30 }
  0x61   : > { %338 = vrcp.f32 %v168_v31 }
  0x6a   : > { %v337_v34 = vpop.eup %336 }
  0x6b   : > { %v339_v35 = vpop.eup %338  ;;  %v175_v36 = vmul.f32 %v337_v34, %v173_v32 }
  0x6c   : > { %v176_v37 = vmul.f32 %v339_v35, %v174_v33 }
  0x6d   : > { %177 = vst [vmem:[%s134_s17] sm:$0xff] %v175_v36 }
  0x6e   : > { %178 = vst [vmem:[%s134_s17 + $0x8] sm:$0xff] %v176_v37 }
  0x6f   : > { %383 = shalt.err (!%p380_p2)
}
  0x70   : > { %s384_s13 = scalar_lea.hbm %s576_s2, 256  ;;  %s388_s20 = scalar_lea.hbm %s621_s1, 512 }
  0x71   : > { %p385_p4 = scmp.ne.s32.totalorder %s576_s2, %s384_s13  ;;  %p389_p9 = scmp.lt.u32.totalorder %s576_s2, %s621_s1 }
  0x72   : > { %p390_p1 = scmp.lt.u32.totalorder %s388_s20, %s384_s13  ;;  %p392_p6 = scmp.lt.u32.totalorder %s384_s13, %s576_s2 }
  0x73   : > { %p386_p5 = pnand %p385_p4, %p628_p11 }
  0x74   : > { %p391_p3 = por %p390_p1, %p389_p9 }
  0x75   : > { %p387_p7 = pneg %p386_p5 }
  0x76   : > { %p393_p12 = por %p392_p6, %p391_p3 }
  0x78   : > { %p394_p13 = pnand %p393_p12, %p387_p7 }
  0x7a   : > { %397 = shalt.err (!%p394_p13)
}
  0x7b   : > { %s442_s24 = smov 128   ;;  %s443_s26 = smov 8  }
  0x7c   : > { %284 = dma.vmem_to_hbm [thread:$0]  (%p628_p11), %s571_s25, 256, %s576_s2, %s180_s3, %s442_s24, %s442_s24, %s443_s26  }
  0x7d PF: > { %s208_s30 = sand.u32 1, %s424_s6   ;;  %p629_p8 = scmp.ne.s32.totalorder %s626_s19, 0 }
  0x7e   : > { %p630_p10 = scmp.ge.s32.totalorder %s436_s9, 2  ;;  %s209_s17 = scalar_lea.sflag [#allocation4], %s208_s30 }
  0x80   : > { %p291_p0 = pnand %p630_p10, %p629_p8 }
  0x82   : > { %419 = dma.done.wait (!%p291_p0), %s209_s17, 256  }
  0x83   : > { %421 = vsyncadd (!%p291_p0), %s209_s17, 4294967040  ;;  %p14_p2 = scmp.ge.s32.totalorder %s479_s12, 4   ;;  %s631_s6 = smov %s428_s7 }
  0x84   : > { %s632_s7 = smov %s432_s8  ;;  %s633_s8 = smov %s491_s15 }
  0x85   : > { %s634_s9 = smov %s479_s12  ;;  %16 = sbr.rel (!%p14_p2) target bundleno = 5 (0x5), region = 69 }
  0x8c   :  { %214 = vsyncpa [#allocation3], 1 }
  0x8d   :  { %216 = vsyncpa [#allocation3 + $0x1], 1 }
  0x8e   :  { %217 = vsyncpa [#allocation4], 1 }
  0x8f   :  { %219 = vsyncpa [#allocation4 + $0x1], 1 }

</bundles_post_ra>
